<compile_context>
chip_gen: v6e
topology: v6e:2x2x1
jax: 0.10.0
libtpu: 0.0.40
codegen_flags: <defaults>
</compile_context>

<pallas_src>
import jax
import jax.numpy as jnp
from jax import lax
from jax.experimental import pallas as pl
from jax.experimental.pallas import tpu as pltpu


def _round_up(v: int, m: int) -> int:
    return (v + m - 1) // m * m


def gcn_kernel(src_ref, dst_ref, xw_ref, out_ref):
    """One (feature_tile, edge_tile) grid step.

    src_ref : (TE, 1) int32 edge sources (sublane-major; -1 padding).
    dst_ref : (1, TE) int32 edge destinations (lane-major; -1 padding).
    xw_ref  : (Npad, Ftile) f32 pre-folded features x @ W^T (zero-padded rows/cols).
    out_ref : (Npad, Ftile) f32 output block, resident across the edge axis.
    """
    ei = pl.program_id(1)

    @pl.when(ei == 0)
    def _():
        out_ref[...] = jnp.zeros_like(out_ref)

    n_pad = xw_ref.shape[0]

    # One-hot gather matrix: srcmat[e, n] = (src[e] == n); edges on sublanes.
    node_ids_row = lax.broadcasted_iota(jnp.int32, (1, n_pad), 1)
    srcmat = (src_ref[...] == node_ids_row).astype(jnp.float32)        # (TE, Npad)

    # One-hot scatter matrix: dmat[n, e] = (dst[e] == n); edges on lanes.
    node_ids_col = lax.broadcasted_iota(jnp.int32, (n_pad, 1), 0)
    dmat = (dst_ref[...] == node_ids_col).astype(jnp.float32)          # (Npad, TE)

    # Gather: per-edge (weight-folded) source features.  Padding edges (-1) match
    # no node, so their rows are zero and contribute nothing below.
    g = jnp.dot(srcmat, xw_ref[...],
                preferred_element_type=jnp.float32)                    # (TE, Ftile)

    # Scatter-sum into destination rows (accumulated across edge tiles).
    out_ref[...] += jnp.dot(dmat, g, preferred_element_type=jnp.float32)


def mygcn_forward(x, edge_index, weight, *, edge_tile=1024):
    """x: (N, F_in) f32; edge_index: (2, E) int; weight: (F_out, F_in).

    The reference forward() always constructs a zero bias, so none is added.
    """
    N, f_in = x.shape
    f_out = weight.shape[0]
    E = edge_index.shape[1]

    # Lane/sublane-friendly padding.
    n_pad = _round_up(max(N, 8), 128)
    f_out_pad = _round_up(max(f_out, 128), 128)

    # Feature tile: 256-wide where it divides (MXU-width friendly on v6e/v7x,
    # and >= 2 tiles -> megacore sharding once F_out >= 512); else 128.
    f_tile = 256 if (f_out_pad % 256 == 0) else 128
    f_tile = min(f_tile, f_out_pad)

    # Edge tile: multiple of 128, large to amortize per-grid-step overhead.
    te = min(_round_up(edge_tile, 128), _round_up(max(E, 1), 128))
    e_pad = _round_up(max(E, 1), te)

    # Pre-fold the weight: xw = x @ W^T, zero-padded to (Npad, Fout_pad).
    x_p = jnp.zeros((n_pad, f_in), jnp.float32).at[:N].set(
        jnp.asarray(x, jnp.float32))
    w_t = jnp.asarray(weight, jnp.float32).T                      # (F_in, F_out)
    xw = jnp.zeros((n_pad, f_out_pad), jnp.float32).at[:, :f_out].set(x_p @ w_t)

    # Edge endpoints, padded with -1 so padding never matches any node id.
    src = jnp.full((e_pad, 1), -1, jnp.int32).at[:E, 0].set(
        edge_index[0].astype(jnp.int32))
    dst = jnp.full((1, e_pad), -1, jnp.int32).at[0, :E].set(
        edge_index[1].astype(jnp.int32))

    grid = (f_out_pad // f_tile, e_pad // te)

    # Explicit scoped-VMEM budget: xw (double-buffered) + resident out block +
    # one-hot temporaries + gathered tile, with 2x headroom; floor 16 MiB
    # (v5e default), cap 64 MiB (v7x physical).
    est = 4 * (4 * n_pad * f_tile        # xw (x2 buffers) + out block (x2 slack)
               + 2 * te * n_pad          # srcmat + dmat temporaries
               + te * f_tile)            # gathered g
    est += 8 * te * 4                    # edge blocks (double-buffered)
    vmem_limit = int(min(64 << 20, max(16 << 20, 2 * est)))

    out_p = pl.pallas_call(
        gcn_kernel,
        out_shape=jax.ShapeDtypeStruct((n_pad, f_out_pad), jnp.float32),
        grid_spec=pltpu.PrefetchScalarGridSpec(
            num_scalar_prefetch=0,
            grid=grid,
            in_specs=[
                pl.BlockSpec((te, 1), lambda fi, ei: (ei, 0)),             # src
                pl.BlockSpec((1, te), lambda fi, ei: (0, ei)),             # dst
                pl.BlockSpec((n_pad, f_tile), lambda fi, ei: (0, fi)),     # xw
            ],
            out_specs=pl.BlockSpec((n_pad, f_tile), lambda fi, ei: (0, fi)),
        ),
        compiler_params=pltpu.CompilerParams(
            dimension_semantics=("parallel", "arbitrary"),
            vmem_limit_bytes=vmem_limit),
    )(src, dst, xw)

    return out_p[:N, :f_out]


if __name__ == "__main__":
    # Small, deterministic problem instance.
    N, F_IN, F_OUT, E = 16, 8, 32, 64

    key = jax.random.PRNGKey(0)
    k_x, k_w, k_src, k_dst = jax.random.split(key, 4)

    x = jax.random.normal(k_x, (N, F_IN), dtype=jnp.float32)

    # glorot init of nn.Linear(in_dim, out_dim, bias=False).weight -> (F_OUT, F_IN)
    stdv = (6.0 / (F_OUT + F_IN)) ** 0.5
    weight = jax.random.uniform(k_w, (F_OUT, F_IN), dtype=jnp.float32,
                                minval=-stdv, maxval=stdv)

    edge_src = jax.random.randint(k_src, (E,), 0, N, dtype=jnp.int32)
    edge_dst = jax.random.randint(k_dst, (E,), 0, N, dtype=jnp.int32)
    edge_index = jnp.stack([edge_src, edge_dst], axis=0)            # (2, E)

    out = mygcn_forward(x, edge_index, weight)
    out = jax.block_until_ready(out)

    # Pure-JAX reference: gather -> segment-sum -> linear (+ zero bias, as in forward()).
    x_j = x[edge_src]                                               # (E, F_in)
    agg = jax.ops.segment_sum(x_j, edge_dst, num_segments=N)        # (N, F_in)
    bias = jnp.zeros((F_OUT,), dtype=jnp.float32)
    ref = agg @ weight.T + bias[None, :]

    assert out.shape == (N, F_OUT)
    assert jnp.allclose(out, ref, atol=1e-4, rtol=1e-4), "mismatch vs reference"
    print("KERNEL_OK")
</pallas_src>

<mosaic_0001>
module attributes {stable_mosaic.version = 11 : i64} {
  func.func @gcn_kernel(%arg0: i32, %arg1: i32, %arg2: memref<128x1xi32, #tpu.memory_space<vmem>>, %arg3: memref<1x128xi32, #tpu.memory_space<vmem>>, %arg4: memref<128x128xf32, #tpu.memory_space<vmem>>, %arg5: memref<128x128xf32, #tpu.memory_space<vmem>>) attributes {dimension_semantics = [#tpu.dimension_semantics<parallel>, #tpu.dimension_semantics<arbitrary>], iteration_bounds = array<i64: 1, 1>, scalar_prefetch = 0 : i64, scratch_operands = 0 : i64, tpu.core_type = #tpu.core_type<tc>, window_params = [{transform_indices = @transform_0, window_bounds = array<i64: 128, 1>}, {transform_indices = @transform_1, window_bounds = array<i64: 1, 128>}, {transform_indices = @transform_2, window_bounds = array<i64: 128, 128>}, {transform_indices = @transform_3, window_bounds = array<i64: 128, 128>}]} {
    %c0_i32 = arith.constant 0 : i32
    %0 = arith.cmpi eq, %arg1, %c0_i32 : i32
    %1 = arith.extui %0 : i1 to i32
    %c0_i32_0 = arith.constant 0 : i32
    %2 = arith.cmpi ne, %1, %c0_i32_0 : i32
    scf.if %2 {
      %cst_11 = arith.constant 0.000000e+00 : f32
      %23 = vector.broadcast %cst_11 : f32 to vector<128x128xf32>
      %c0_12 = arith.constant 0 : index
      %c0_13 = arith.constant 0 : index
      %24 = vector.load %arg5[%c0_12, %c0_13] : memref<128x128xf32, #tpu.memory_space<vmem>>, vector<128x128xf32>
      tpu.vector_store %arg5[%c0_12, %c0_13], %23 {strides = array<i32>} : memref<128x128xf32, #tpu.memory_space<vmem>>, vector<128x128xf32>,
    } else {
    }
    %3 = tpu.iota {dimensions = array<i32: 1>} : vector<1x128xi32>
    %c0 = arith.constant 0 : index
    %c0_1 = arith.constant 0 : index
    %4 = vector.load %arg2[%c0, %c0_1] : memref<128x1xi32, #tpu.memory_space<vmem>>, vector<128x1xi32>
    %5 = vector.broadcast %4 : vector<128x1xi32> to vector<128x128xi32>
    %6 = vector.broadcast %3 : vector<1x128xi32> to vector<128x128xi32>
    %7 = arith.cmpi eq, %5, %6 : vector<128x128xi32>
    %8 = arith.extui %7 : vector<128x128xi1> to vector<128x128xi32>
    %9 = arith.sitofp %8 : vector<128x128xi32> to vector<128x128xf32>
    %10 = tpu.iota {dimensions = array<i32: 0>} : vector<128x1xi32>
    %c0_2 = arith.constant 0 : index
    %c0_3 = arith.constant 0 : index
    %11 = vector.load %arg3[%c0_2, %c0_3] : memref<1x128xi32, #tpu.memory_space<vmem>>, vector<1x128xi32>
    %12 = vector.broadcast %11 : vector<1x128xi32> to vector<128x128xi32>
    %13 = vector.broadcast %10 : vector<128x1xi32> to vector<128x128xi32>
    %14 = arith.cmpi eq, %12, %13 : vector<128x128xi32>
    %15 = arith.extui %14 : vector<128x128xi1> to vector<128x128xi32>
    %16 = arith.sitofp %15 : vector<128x128xi32> to vector<128x128xf32>
    %c0_4 = arith.constant 0 : index
    %c0_5 = arith.constant 0 : index
    %17 = vector.load %arg4[%c0_4, %c0_5] : memref<128x128xf32, #tpu.memory_space<vmem>>, vector<128x128xf32>
    %cst = arith.constant dense<0.000000e+00> : vector<128x128xf32>
    %18 = tpu.matmul %9, %17, %cst {dimension_numbers = #tpu.dot_dimension_numbers<[1], [0], [0], [1], [0, 0, 1, 1], [], []>} : vector<128x128xf32>, vector<128x128xf32>, vector<128x128xf32> -> vector<128x128xf32>
    %c0_6 = arith.constant 0 : index
    %c0_7 = arith.constant 0 : index
    %19 = vector.load %arg5[%c0_6, %c0_7] : memref<128x128xf32, #tpu.memory_space<vmem>>, vector<128x128xf32>
    %cst_8 = arith.constant dense<0.000000e+00> : vector<128x128xf32>
    %20 = tpu.matmul %16, %18, %cst_8 {dimension_numbers = #tpu.dot_dimension_numbers<[1], [0], [0], [1], [0, 0, 1, 1], [], []>} : vector<128x128xf32>, vector<128x128xf32>, vector<128x128xf32> -> vector<128x128xf32>
    %21 = arith.addf %19, %20 : vector<128x128xf32>
    %c0_9 = arith.constant 0 : index
    %c0_10 = arith.constant 0 : index
    %22 = vector.load %arg5[%c0_9, %c0_10] : memref<128x128xf32, #tpu.memory_space<vmem>>, vector<128x128xf32>
    tpu.vector_store %arg5[%c0_9, %c0_10], %21 {strides = array<i32>} : memref<128x128xf32, #tpu.memory_space<vmem>>, vector<128x128xf32>,
    return
  }
  func.func @transform_0(%arg0: i32, %arg1: i32) -> (i32, i32) {
    %c0_i32 = arith.constant 0 : i32
    %c0_i32_0 = arith.constant 0 : i32
    return %arg1, %c0_i32 : i32, i32
  }
  func.func @transform_1(%arg0: i32, %arg1: i32) -> (i32, i32) {
    %c0_i32 = arith.constant 0 : i32
    %c0_i32_0 = arith.constant 0 : i32
    return %c0_i32, %arg1 : i32, i32
  }
  func.func @transform_2(%arg0: i32, %arg1: i32) -> (i32, i32) {
    %c0_i32 = arith.constant 0 : i32
    %c0_i32_0 = arith.constant 0 : i32
    return %c0_i32, %arg0 : i32, i32
  }
  func.func @transform_3(%arg0: i32, %arg1: i32) -> (i32, i32) {
    %c0_i32 = arith.constant 0 : i32
    %c0_i32_0 = arith.constant 0 : i32
    return %c0_i32, %arg0 : i32, i32
  }
}

</mosaic_0001>

<bundles_post_ra>
// kernel: tpu_custom_call.1
= control target key start
LH: loop header
LB: loop body
LE: loop exit
PB: predicated region body
PF: predicated region fallthrough
CT: control target
= control target key end

     0   :  { %v860_v2 = vmov 0   ;;  %s1127_s0 = inlined_call_operand.vmem [shape: s32[128,1], index: 0, kind: input, shape index: {}]   ;;  %s1128_s1 = inlined_call_operand.vmem [shape: s32[1,128], index: 1, kind: input, shape index: {}]   ;;  %s1129_s2 = inlined_call_operand.vmem [shape: f32[128,128], index: 2, kind: input, shape index: {}]   ;;  %s1130_s3 = inlined_call_operand.hbm [shape: f32[128,128], index: 3, kind: output, shape index: {}]  }
   0x1   :  { %v39_v0 = vld [vmem:[%s1127_s0 + $0x10] sm:$0xff]  ;;  %v37_v1 = vld [vmem:[%s1127_s0] sm:$0xff]  ;;  %837 = vset.pattern.permute.xlu1 %v860_v2  ;;  %836 = vset.pattern.permute.xlu0 %v860_v2  ;;  %v40_v3 = vld [vmem:[%s1127_s0 + $0x18] sm:$0xff] }
   0x2   :  { %60 = vperm.xlu1 %837, %v39_v0   ;;  %54 = vperm.xlu0 %836, %v37_v1   ;;  %v38_v4 = vld [vmem:[%s1127_s0 + $0x8] sm:$0xff]  ;;  %v234_v5 = vld [vmem:[%s1129_s2 + $0x78] sm:$0xff]  ;;  %v233_v6 = vld [vmem:[%s1129_s2 + $0x70] sm:$0xff] }
   0x3   :  { %v42_v7 = vld [vmem:[%s1127_s0 + $0x28] sm:$0xff]  ;;  %v41_v8 = vld [vmem:[%s1127_s0 + $0x20] sm:$0xff]  ;;  %718 = vmatprep.subr.mxu0 %v234_v5 }
   0x4   :  { %719 = vmatpush3.msra.mxu0 %v234_v5  ;;  %v232_v9 = vld [vmem:[%s1129_s2 + $0x68] sm:$0xff] }
   0x5   :  { %720 = vmatprep.subr.mxu0 %v233_v6 }
   0x6   :  { %63 = vperm.xlu1 %837, %v40_v3   ;;  %57 = vperm.xlu0 %836, %v38_v4  }
   0xa   :  { %69 = vperm.xlu1 %837, %v42_v7   ;;  %66 = vperm.xlu0 %836, %v41_v8  }
   0xb   :  { %8 = vsyncpa [#allocation3], 0  ;;  %v44_v10 = vld [vmem:[%s1127_s0 + $0x38] sm:$0xff]  ;;  %v43_v11 = vld [vmem:[%s1127_s0 + $0x30] sm:$0xff]  ;;  %721 = vmatpush3.msra.mxu0 %v233_v6  ;;  %v35_v33 = vlaneseq  ;;  %v861_v37 = vmov 1.0  }
   0xc   :  { %722 = vmatprep.subr.mxu0 %v232_v9  ;;  %v231_v12 = vld [vmem:[%s1129_s2 + $0x60] sm:$0xff]  ;;  %v230_v13 = vld [vmem:[%s1129_s2 + $0x58] sm:$0xff]  ;;  %v46_v14 = vld [vmem:[%s1127_s0 + $0x48] sm:$0xff] }
   0xd   :  { %723 = vmatpush3.msra.mxu0 %v232_v9  ;;  %v45_v15 = vld [vmem:[%s1127_s0 + $0x40] sm:$0xff]  ;;  %v229_v16 = vld [vmem:[%s1129_s2 + $0x50] sm:$0xff]  ;;  %v48_v17 = vld [vmem:[%s1127_s0 + $0x58] sm:$0xff]  ;;  %v36_v34 = vand.u32 127, %v35_v33  ;;  %v150_v52 = vshrl.u32 %v35_v33, 7 }
   0xe   :  { %75 = vperm.xlu1 %837, %v44_v10   ;;  %72 = vperm.xlu0 %836, %v43_v11   ;;  %v47_v18 = vld [vmem:[%s1127_s0 + $0x50] sm:$0xff]  ;;  %v228_v19 = vld [vmem:[%s1129_s2 + $0x48] sm:$0xff]  ;;  %v227_v20 = vld [vmem:[%s1129_s2 + $0x40] sm:$0xff] }
   0xf   :  { %724 = vmatprep.subr.mxu0 %v231_v12  ;;  %v50_v21 = vld [vmem:[%s1127_s0 + $0x68] sm:$0xff]  ;;  %v49_v22 = vld [vmem:[%s1127_s0 + $0x60] sm:$0xff]  ;;  %v226_v23 = vld [vmem:[%s1129_s2 + $0x38] sm:$0xff]  ;;  %v1002_v54 = vadd.s32 8, %v150_v52  ;;  %v1008_v55 = vadd.s32 16, %v150_v52  ;;  %v1010_v56 = vadd.s32 24, %v150_v52 }
  0x10   :  { %725 = vmatpush3.msra.mxu0 %v231_v12  ;;  %v52_v24 = vld [vmem:[%s1127_s0 + $0x78] sm:$0xff]  ;;  %v51_v25 = vld [vmem:[%s1127_s0 + $0x70] sm:$0xff]  ;;  %v224_v27 = vld [vmem:[%s1129_s2 + $0x28] sm:$0xff]  ;;  %v1016_v57 = vadd.s32 32, %v150_v52  ;;  %v1018_v58 = vadd.s32 40, %v150_v52  ;;  %v1024_v59 = vadd.s32 48, %v150_v52 }
  0x11   :  { %726 = vmatprep.subr.mxu0 %v230_v13  ;;  %v225_v26 = vld [vmem:[%s1129_s2 + $0x30] sm:$0xff]  ;;  %v223_v28 = vld [vmem:[%s1129_s2 + $0x20] sm:$0xff]  ;;  %v222_v29 = vld [vmem:[%s1129_s2 + $0x18] sm:$0xff]  ;;  %v1026_v60 = vadd.s32 56, %v150_v52  ;;  %v1032_v61 = vadd.s32 64, %v150_v52  ;;  %v1034_v62 = vadd.s32 72, %v150_v52 }
  0x12   :  { %81 = vperm.xlu1 %837, %v46_v14   ;;  %78 = vperm.xlu0 %836, %v45_v15   ;;  %v221_v30 = vld [vmem:[%s1129_s2 + $0x10] sm:$0xff]  ;;  %v220_v31 = vld [vmem:[%s1129_s2 + $0x8] sm:$0xff]  ;;  %v219_v32 = vld [vmem:[%s1129_s2] sm:$0xff]  ;;  %v1040_v63 = vadd.s32 80, %v150_v52  ;;  %v1042_v0 = vadd.s32 88, %v150_v52  ;;  %v1048_v1 = vadd.s32 96, %v150_v52 }
  0x13   :  { %727 = vmatpush3.msra.mxu0 %v230_v13  ;;  %v1000_v53 = vld [vmem:[%s1128_s1] ss:$0 sm:$0xff]  ;;  %v1050_v2 = vadd.s32 104, %v150_v52  ;;  %v1056_v3 = vadd.s32 112, %v150_v52  ;;  %v1058_v4 = vadd.s32 120, %v150_v52  ;;  %s862_s1 = smov [#allocation2]  }
  0x14   :  { %728 = vmatprep.subr.mxu0 %v229_v16  ;;  %s578_s22 = sshll.u32 %s862_s1, 4  ;;  %s579_s22 = int_to_ptr.vmem [resolvable:$true] %s578_s22 }
  0x15   :  { %729 = vmatpush3.msra.mxu0 %v229_v16  ;;  %s838_s23 = scalar_lea.vmem %s579_s22, 2048  ;;  %p843_p1 = scmp.lt.s32.totalorder %s579_s22, %s579_s22 }
  0x16   :  { %87 = vperm.xlu1 %837, %v48_v17   ;;  %84 = vperm.xlu0 %836, %v47_v18   ;;  %p839_p0 = scmp.ne.s32.totalorder %s579_s22, %s838_s23  ;;  %p844_p2 = scmp.lt.s32.totalorder %s838_s23, %s838_s23 }
  0x17   :  { %730 = vmatprep.subr.mxu0 %v228_v19 }
  0x18   :  { %731 = vmatpush3.msra.mxu0 %v228_v19  ;;  %p845_p3 = por %p844_p2, %p843_p1 }
  0x19   :  { %732 = vmatprep.subr.mxu0 %v227_v20 }
  0x1a   :  { %93 = vperm.xlu1 %837, %v50_v21   ;;  %90 = vperm.xlu0 %836, %v49_v22   ;;  %p846_p4 = pnand %p845_p3, %p839_p0 }
  0x1b   :  { %733 = vmatpush3.msra.mxu0 %v227_v20 }
  0x1c   :  { %734 = vmatprep.subr.mxu0 %v226_v23 }
  0x1d   :  { %735 = vmatpush3.msra.mxu0 %v226_v23 }
  0x1e   :  { %99 = vperm.xlu1 %837, %v52_v24   ;;  %96 = vperm.xlu0 %836, %v51_v25  }
  0x1f   :  { %736 = vmatprep.subr.mxu0 %v225_v26 }
  0x20   :  { %737 = vmatpush3.msra.mxu0 %v225_v26 }
  0x21   :  { %738 = vmatprep.subr.mxu0 %v224_v27 }
  0x22   :  { %739 = vmatpush3.msra.mxu0 %v224_v27 }
  0x23   :  { %740 = vmatprep.subr.mxu0 %v223_v28 }
  0x24   :  { %741 = vmatpush3.msra.mxu0 %v223_v28 }
  0x25   :  { %742 = vmatprep.subr.mxu0 %v222_v29 }
  0x26   :  { %743 = vmatpush3.msra.mxu0 %v222_v29 }
  0x27   :  { %744 = vmatprep.subr.mxu0 %v221_v30 }
  0x28   :  { %745 = vmatpush3.msra.mxu0 %v221_v30 }
  0x29   :  { %746 = vmatprep.subr.mxu0 %v220_v31 }
  0x2a   :  { %747 = vmatpush3.msra.mxu0 %v220_v31 }
  0x2b   :  { %748 = vmatprep.subr.mxu0 %v219_v32 }
  0x2c   :  { %749 = vmatpush3.msra.mxu0 %v219_v32 }
  0x7d   :  { %v61_v35 = vpop.permute.xlu1 %60  ;;  %v55_v36 = vpop.permute.xlu0 %54 }
  0x7e   :  { %vm101_vm0 = vcmp.eq.s32.totalorder %v55_v36, %v36_v34  ;;  %vm103_vm1 = vcmp.eq.s32.totalorder %v61_v35, %v36_v34 }
  0x7f   :  { %750 = vmatprep.mubr.msk.f32.mxu0 %vm101_vm0, %v861_v37  ;;  %vm171_vm0 = vcmp.eq.s32.totalorder %v1000_v53, %v150_v52 }
  0x80   :  { %806 = vmatprep.mubr.msk.f32.mxu1 %vm171_vm0, %v861_v37 }
  0x81   :  { %v64_v38 = vpop.permute.xlu1 %63  ;;  %v58_v39 = vpop.permute.xlu0 %57 }
  0x82   :  { %vm102_vm2 = vcmp.eq.s32.totalorder %v58_v39, %v36_v34  ;;  %vm104_vm3 = vcmp.eq.s32.totalorder %v64_v38, %v36_v34 }
  0x83   :  { %751 = vmatmul.mubr.msk.f32.vlgmr.msra.gmra.mxu0 %vm102_vm2, %v861_v37  ;;  %vm173_vm2 = vcmp.eq.s32.totalorder %v1000_v53, %v1008_v55 }
  0x84   :  { %753 = vmatprep.mubr.msk.f32.mxu0 %vm103_vm1, %v861_v37  ;;  %vm172_vm1 = vcmp.eq.s32.totalorder %v1000_v53, %v1002_v54 }
  0x85   :  { %v70_v40 = vpop.permute.xlu1 %69  ;;  %v67_v41 = vpop.permute.xlu0 %66 }
  0x86   :  { %vm105_vm4 = vcmp.eq.s32.totalorder %v67_v41, %v36_v34  ;;  %vm106_vm5 = vcmp.eq.s32.totalorder %v70_v40, %v36_v34 }
  0x87   :  { %754 = vmatmul.mubr.msk.f32.gmra.mxu0 %vm104_vm3, %v861_v37  ;;  %vm174_vm3 = vcmp.eq.s32.totalorder %v1000_v53, %v1010_v56 }
  0x88   :  { %756 = vmatprep.mubr.msk.f32.mxu0 %vm105_vm4, %v861_v37  ;;  %vm175_vm4 = vcmp.eq.s32.totalorder %v1000_v53, %v1016_v57 }
  0x89   :  { %v76_v42 = vpop.permute.xlu1 %75  ;;  %v73_v43 = vpop.permute.xlu0 %72 }
  0x8a   :  { %vm107_vm6 = vcmp.eq.s32.totalorder %v73_v43, %v36_v34  ;;  %vm108_vm7 = vcmp.eq.s32.totalorder %v76_v42, %v36_v34 }
  0x8b   :  { %757 = vmatmul.mubr.msk.f32.gmra.mxu0 %vm106_vm5, %v861_v37  ;;  %vm176_vm5 = vcmp.eq.s32.totalorder %v1000_v53, %v1018_v58 }
  0x8c   :  { %759 = vmatprep.mubr.msk.f32.mxu0 %vm107_vm6, %v861_v37  ;;  %vm177_vm6 = vcmp.eq.s32.totalorder %v1000_v53, %v1024_v59 }
  0x8d   :  { %v82_v44 = vpop.permute.xlu1 %81  ;;  %v79_v45 = vpop.permute.xlu0 %78 }
  0x8e   :  { %vm109_vm8 = vcmp.eq.s32.totalorder %v79_v45, %v36_v34  ;;  %vm110_vm9 = vcmp.eq.s32.totalorder %v82_v44, %v36_v34 }
  0x8f   :  { %760 = vmatmul.mubr.msk.f32.gmra.mxu0 %vm108_vm7, %v861_v37  ;;  %vm178_vm7 = vcmp.eq.s32.totalorder %v1000_v53, %v1026_v60 }
  0x90   :  { %762 = vmatprep.mubr.msk.f32.mxu0 %vm109_vm8, %v861_v37  ;;  %vm179_vm8 = vcmp.eq.s32.totalorder %v1000_v53, %v1032_v61 }
  0x91   :  { %v88_v46 = vpop.permute.xlu1 %87  ;;  %v85_v47 = vpop.permute.xlu0 %84 }
  0x92   :  { %vm111_vm10 = vcmp.eq.s32.totalorder %v85_v47, %v36_v34  ;;  %vm112_vm11 = vcmp.eq.s32.totalorder %v88_v46, %v36_v34 }
  0x93   :  { %763 = vmatmul.mubr.msk.f32.gmra.mxu0 %vm110_vm9, %v861_v37  ;;  %vm180_vm9 = vcmp.eq.s32.totalorder %v1000_v53, %v1034_v62 }
  0x94   :  { %765 = vmatprep.mubr.msk.f32.mxu0 %vm111_vm10, %v861_v37  ;;  %vm181_vm10 = vcmp.eq.s32.totalorder %v1000_v53, %v1040_v63 }
  0x95   :  { %v94_v48 = vpop.permute.xlu1 %93  ;;  %v91_v49 = vpop.permute.xlu0 %90 }
  0x96   :  { %vm113_vm12 = vcmp.eq.s32.totalorder %v91_v49, %v36_v34  ;;  %vm114_vm13 = vcmp.eq.s32.totalorder %v94_v48, %v36_v34 }
  0x97   :  { %766 = vmatmul.mubr.msk.f32.gmra.mxu0 %vm112_vm11, %v861_v37  ;;  %vm182_vm11 = vcmp.eq.s32.totalorder %v1000_v53, %v1042_v0 }
  0x98   :  { %768 = vmatprep.mubr.msk.f32.mxu0 %vm113_vm12, %v861_v37  ;;  %vm183_vm12 = vcmp.eq.s32.totalorder %v1000_v53, %v1048_v1 }
  0x99   :  { %v97_v50 = vpop.permute.xlu0 %96  ;;  %v100_v51 = vpop.permute.xlu1 %99 }
  0x9a   :  { %vm115_vm14 = vcmp.eq.s32.totalorder %v97_v50, %v36_v34  ;;  %vm116_vm15 = vcmp.eq.s32.totalorder %v100_v51, %v36_v34 }
  0x9b   :  { %769 = vmatmul.mubr.msk.f32.gmra.mxu0 %vm114_vm13, %v861_v37  ;;  %vm184_vm13 = vcmp.eq.s32.totalorder %v1000_v53, %v1050_v2 }
  0x9c   :  { %771 = vmatprep.mubr.msk.f32.mxu0 %vm115_vm14, %v861_v37  ;;  %vm185_vm14 = vcmp.eq.s32.totalorder %v1000_v53, %v1056_v3 }
  0x9f   :  { %772 = vmatmul.mubr.msk.f32.gmra.mxu0 %vm116_vm15, %v861_v37  ;;  %vm186_vm15 = vcmp.eq.s32.totalorder %v1000_v53, %v1058_v4 }
 0x143   :  { %v752_v5 = vpop.f32.mrf.mxu0 }
 0x145   :  { %v301_v6 = vpop.f32.mrf.mxu0 }
 0x147   :  { %v755_v7 = vpop.f32.mrf.mxu0 }
 0x149   :  { %v311_v8 = vpop.f32.mrf.mxu0 }
 0x14b   :  { %v758_v9 = vpop.f32.mrf.mxu0 }
 0x14d   :  { %v321_v10 = vpop.f32.mrf.mxu0 }
 0x14f   :  { %v761_v11 = vpop.f32.mrf.mxu0 }
 0x151   :  { %v331_v12 = vpop.f32.mrf.mxu0 }
 0x153   :  { %v764_v13 = vpop.f32.mrf.mxu0 }
 0x155   :  { %v341_v14 = vpop.f32.mrf.mxu0 }
 0x157   :  { %v767_v15 = vpop.f32.mrf.mxu0 }
 0x159   :  { %v351_v16 = vpop.f32.mrf.mxu0 }
 0x15b   :  { %v770_v17 = vpop.f32.mrf.mxu0 }
 0x15d   :  { %v361_v18 = vpop.f32.mrf.mxu0 }
 0x15f   :  { %v773_v19 = vpop.f32.mrf.mxu0 }
 0x160   :  { %774 = vmatprep.subr.mxu1 %v773_v19 }
 0x161   :  { %v371_v20 = vpop.f32.mrf.mxu0  ;;  %775 = vmatpush3.msra.mxu1 %v773_v19 }
 0x162   :  { %776 = vmatprep.subr.mxu1 %v371_v20 }
 0x163   :  { %777 = vmatpush3.msra.mxu1 %v371_v20 }
 0x164   :  { %778 = vmatprep.subr.mxu1 %v770_v17 }
 0x165   :  { %779 = vmatpush3.msra.mxu1 %v770_v17 }
 0x166   :  { %780 = vmatprep.subr.mxu1 %v361_v18 }
 0x167   :  { %781 = vmatpush3.msra.mxu1 %v361_v18 }
 0x168   :  { %782 = vmatprep.subr.mxu1 %v767_v15 }
 0x169   :  { %783 = vmatpush3.msra.mxu1 %v767_v15 }
 0x16a   :  { %784 = vmatprep.subr.mxu1 %v351_v16 }
 0x16b   :  { %785 = vmatpush3.msra.mxu1 %v351_v16 }
 0x16c   :  { %786 = vmatprep.subr.mxu1 %v764_v13 }
 0x16d   :  { %787 = vmatpush3.msra.mxu1 %v764_v13 }
 0x16e   :  { %788 = vmatprep.subr.mxu1 %v341_v14 }
 0x16f   :  { %789 = vmatpush3.msra.mxu1 %v341_v14 }
 0x170   :  { %790 = vmatprep.subr.mxu1 %v761_v11 }
 0x171   :  { %791 = vmatpush3.msra.mxu1 %v761_v11 }
 0x172   :  { %792 = vmatprep.subr.mxu1 %v331_v12 }
 0x173   :  { %793 = vmatpush3.msra.mxu1 %v331_v12 }
 0x174   :  { %794 = vmatprep.subr.mxu1 %v758_v9 }
 0x175   :  { %795 = vmatpush3.msra.mxu1 %v758_v9 }
 0x176   :  { %796 = vmatprep.subr.mxu1 %v321_v10 }
 0x177   :  { %797 = vmatpush3.msra.mxu1 %v321_v10 }
 0x178   :  { %798 = vmatprep.subr.mxu1 %v755_v7 }
 0x179   :  { %799 = vmatpush3.msra.mxu1 %v755_v7 }
 0x17a   :  { %800 = vmatprep.subr.mxu1 %v311_v8 }
 0x17b   :  { %801 = vmatpush3.msra.mxu1 %v311_v8 }
 0x17c   :  { %802 = vmatprep.subr.mxu1 %v752_v5 }
 0x17d   :  { %803 = vmatpush3.msra.mxu1 %v752_v5 }
 0x17e   :  { %804 = vmatprep.subr.mxu1 %v301_v6 }
 0x17f   :  { %805 = vmatpush3.msra.mxu1 %v301_v6 }
 0x180   :  { %807 = vmatmul.mubr.msk.f32.vlgmr.msra.gmra.mxu1 %vm172_vm1, %v861_v37 }
 0x181   :  { %809 = vmatprep.mubr.msk.f32.mxu1 %vm173_vm2, %v861_v37 }
 0x184   :  { %810 = vmatmul.mubr.msk.f32.gmra.mxu1 %vm174_vm3, %v861_v37 }
 0x185   :  { %812 = vmatprep.mubr.msk.f32.mxu1 %vm175_vm4, %v861_v37 }
 0x188   :  { %813 = vmatmul.mubr.msk.f32.gmra.mxu1 %vm176_vm5, %v861_v37 }
 0x189   :  { %815 = vmatprep.mubr.msk.f32.mxu1 %vm177_vm6, %v861_v37 }
 0x18c   :  { %816 = vmatmul.mubr.msk.f32.gmra.mxu1 %vm178_vm7, %v861_v37 }
 0x18d   :  { %818 = vmatprep.mubr.msk.f32.mxu1 %vm179_vm8, %v861_v37 }
 0x190   :  { %819 = vmatmul.mubr.msk.f32.gmra.mxu1 %vm180_vm9, %v861_v37 }
 0x191   :  { %821 = vmatprep.mubr.msk.f32.mxu1 %vm181_vm10, %v861_v37 }
 0x194   :  { %822 = vmatmul.mubr.msk.f32.gmra.mxu1 %vm182_vm11, %v861_v37 }
 0x195   :  { %824 = vmatprep.mubr.msk.f32.mxu1 %vm183_vm12, %v861_v37 }
 0x198   :  { %825 = vmatmul.mubr.msk.f32.gmra.mxu1 %vm184_vm13, %v861_v37 }
 0x199   :  { %827 = vmatprep.mubr.msk.f32.mxu1 %vm185_vm14, %v861_v37 }
 0x19c   :  { %828 = vmatmul.mubr.msk.f32.gmra.mxu1 %vm186_vm15, %v861_v37 }
 0x240   :  { %v808_v21 = vpop.f32.mrf.mxu1 }
 0x241   :  { %558 = vst [vmem:[#allocation2 + $0x8] sm:$0xff] %v808_v21 }
 0x242   :  { %v462_v22 = vpop.f32.mrf.mxu1 }
 0x243   :  { %557 = vst [vmem:[#allocation2] sm:$0xff] %v462_v22 }
 0x244   :  { %v811_v23 = vpop.f32.mrf.mxu1 }
 0x245   :  { %560 = vst [vmem:[#allocation2 + $0x18] sm:$0xff] %v811_v23 }
 0x246   :  { %v472_v24 = vpop.f32.mrf.mxu1 }
 0x247   :  { %559 = vst [vmem:[#allocation2 + $0x10] sm:$0xff] %v472_v24 }
 0x248   :  { %v814_v25 = vpop.f32.mrf.mxu1 }
 0x249   :  { %562 = vst [vmem:[#allocation2 + $0x28] sm:$0xff] %v814_v25 }
 0x24a   :  { %v482_v26 = vpop.f32.mrf.mxu1 }
 0x24b   :  { %561 = vst [vmem:[#allocation2 + $0x20] sm:$0xff] %v482_v26 }
 0x24c   :  { %v817_v27 = vpop.f32.mrf.mxu1 }
 0x24d   :  { %564 = vst [vmem:[#allocation2 + $0x38] sm:$0xff] %v817_v27 }
 0x24e   :  { %v492_v28 = vpop.f32.mrf.mxu1 }
 0x24f   :  { %563 = vst [vmem:[#allocation2 + $0x30] sm:$0xff] %v492_v28 }
 0x250   :  { %v820_v29 = vpop.f32.mrf.mxu1 }
 0x251   :  { %566 = vst [vmem:[#allocation2 + $0x48] sm:$0xff] %v820_v29 }
 0x252   :  { %v502_v30 = vpop.f32.mrf.mxu1 }
 0x253   :  { %565 = vst [vmem:[#allocation2 + $0x40] sm:$0xff] %v502_v30 }
 0x254   :  { %v823_v31 = vpop.f32.mrf.mxu1 }
 0x255   :  { %568 = vst [vmem:[#allocation2 + $0x58] sm:$0xff] %v823_v31 }
 0x256   :  { %v512_v32 = vpop.f32.mrf.mxu1 }
 0x257   :  { %567 = vst [vmem:[#allocation2 + $0x50] sm:$0xff] %v512_v32 }
 0x258   :  { %v826_v33 = vpop.f32.mrf.mxu1 }
 0x259   :  { %570 = vst [vmem:[#allocation2 + $0x68] sm:$0xff] %v826_v33 }
 0x25a   :  { %v522_v34 = vpop.f32.mrf.mxu1 }
 0x25b   :  { %569 = vst [vmem:[#allocation2 + $0x60] sm:$0xff] %v522_v34 }
 0x25c   :  { %v829_v35 = vpop.f32.mrf.mxu1 }
 0x25d   :  { %572 = vst [vmem:[#allocation2 + $0x78] sm:$0xff] %v829_v35 }
 0x25e   :  { %v532_v36 = vpop.f32.mrf.mxu1 }
 0x25f   :  { %571 = vst [vmem:[#allocation2 + $0x70] sm:$0xff] %v532_v36 }
 0x260   :  { %849 = shalt.err (!%p846_p4)
}
 0x261   :  { %s863_s24 = smov 128   ;;  %s864_s25 = smov 8  }
 0x262   :  { %584 = dma.vmem_to_hbm [thread:$0]  %s579_s22, 2048, %s1130_s3, [#allocation3], %s863_s24, %s863_s24, %s864_s25  }
 0x263   :  { %858 = dma.done.wait [#allocation3], 2048  }
 0x264   :  { %859 = vsyncadd [#allocation3], 4294965248 }
 0x265   :  { %588 = vsyncpa [#allocation3], 1 }

</bundles_post_ra>
